<compile_context>
chip_gen: v7x
topology: tpu7x:2x2x1
jax: 0.10.0
libtpu: 0.0.40
codegen_flags: <defaults>
</compile_context>

<pallas_src>
import functools

import jax
import jax.numpy as jnp
from jax.experimental import pallas as pl
from jax.experimental.pallas import tpu as pltpu


def _round_up(n, m):
    return ((n + m - 1) // m) * m


# ---------------------------------------------------------------------------
# Kernels
# ---------------------------------------------------------------------------
def _ffn_resident_kernel(x_ref, w1_ref, b1_ref, w2_ref, b2_ref, o_ref):
    """Both weight matrices VMEM-resident; one batch tile per grid step."""
    h = jnp.dot(x_ref[...], w1_ref[...], preferred_element_type=jnp.float32)
    h = jnp.maximum(h + b1_ref[...], 0.0)        # f32 epilogue (v5e has no bf16 VPU)
    # dropout(p=0) is the identity; nothing to do.
    if h.dtype != w2_ref.dtype:                  # only pay the cast for bf16 weights
        h = h.astype(w2_ref.dtype)
    y = jnp.dot(h, w2_ref[...], preferred_element_type=jnp.float32) + b2_ref[...]
    o_ref[...] = y.astype(o_ref.dtype)


def _ffn_stream_kernel(x_ref, w1_ref, b1_ref, w2_ref, b2_ref, o_ref, acc_ref):
    """Hidden-dim streaming: grid = (batch tiles, hidden chunks); f32 accumulator scratch."""
    k = pl.program_id(1)

    @pl.when(k == 0)
    def _():
        acc_ref[...] = jnp.zeros_like(acc_ref)

    h = jnp.dot(x_ref[...], w1_ref[...], preferred_element_type=jnp.float32)
    h = jnp.maximum(h + b1_ref[...], 0.0)        # f32 epilogue
    if h.dtype != w2_ref.dtype:
        h = h.astype(w2_ref.dtype)
    acc_ref[...] += jnp.dot(h, w2_ref[...], preferred_element_type=jnp.float32)

    @pl.when(k == pl.num_programs(1) - 1)
    def _():
        o_ref[...] = (acc_ref[...] + b2_ref[...]).astype(o_ref.dtype)


# ---------------------------------------------------------------------------
# Hardware / capability queries (cached)
# ---------------------------------------------------------------------------
@functools.lru_cache(maxsize=None)
def _single_buffer_supported():
    """Probe whether BlockSpec(pipeline_mode=pl.Buffered(1)) is accepted by this install."""
    def _copy(x_ref, o_ref):
        o_ref[...] = x_ref[...]

    try:
        spec = pl.BlockSpec((8, 128), lambda i: (0, 0),
                            pipeline_mode=pl.Buffered(buffer_count=1))
        out = pl.pallas_call(
            _copy,
            out_shape=jax.ShapeDtypeStruct((8, 128), jnp.float32),
            grid=(1,),
            in_specs=[spec],
            out_specs=pl.BlockSpec((8, 128), lambda i: (0, 0)),
        )(jnp.zeros((8, 128), jnp.float32))
        jax.block_until_ready(out)
        return True
    except Exception:
        return False


@functools.lru_cache(maxsize=None)
def _vmem_budget_bytes():
    """~80% of this generation's per-core VMEM (v5e/v6e ~128 MiB, v7x ~64 MiB)."""
    cap = None
    try:
        cap = getattr(pltpu.get_tpu_info(), "vmem_capacity_bytes", None)
    except Exception:
        cap = None
    if not cap:
        cap = 128 * 1024 * 1024
    return max(int(cap * 0.8), 32 * 1024 * 1024)


# ---------------------------------------------------------------------------
# Tiling plan
# ---------------------------------------------------------------------------
def _plan(B, f_in_p, f_out_p, x_isz, o_isz, p_isz, budget, single_buf,
          tm_override=None, th_override=None):
    """Pick (tm, th, est_bytes).  th=None -> resident-weight kernel, else hidden streaming."""
    nbuf_p = 1 if single_buf else 2

    def res_bytes(tm):
        return (nbuf_p * (f_in_p * f_in_p + f_in_p * f_out_p) * p_isz   # weights
                + nbuf_p * (f_in_p + f_out_p) * 4                       # biases (f32)
                + 2 * tm * f_in_p * x_isz                               # x tiles (2 bufs)
                + 2 * tm * f_out_p * o_isz                              # out tiles (2 bufs)
                + tm * f_in_p * 4)                                      # f32 hidden

    def strm_bytes(tm, th):
        return (2 * (f_in_p * th + th * f_out_p) * p_isz                # streamed w1/w2 chunks
                + 2 * th * 4                                            # b1 chunks
                + nbuf_p * f_out_p * 4                                  # b2 (invariant)
                + 2 * tm * f_in_p * x_isz
                + 2 * tm * f_out_p * o_isz
                + tm * th * 4                                           # f32 hidden chunk
                + tm * f_out_p * 4)                                     # f32 accumulator

    if tm_override is not None:
        tm_cands = [max(8, _round_up(int(tm_override), 8))]
    elif B <= 128:
        base = _round_up(B, 8)
        # Split into 2 grid steps when it costs no padding, so v7x megacore can shard.
        tm_cands = [base // 2] if (base >= 16 and base % 16 == 0) else [base]
    else:
        # Multiples of 128 keep MXU M-passes full; require >= 2 grid steps.
        tm_cands = [t for t in (1024, 512, 256, 128) if B > t] or [128]

    if th_override is None:
        for tm in tm_cands:
            if res_bytes(tm) <= budget:
                return tm, None, res_bytes(tm)
        th_cands = [t for t in (512, 256, 128) if f_in_p % t == 0]
    else:
        th_cands = [int(th_override)]

    for tm in tm_cands:
        for th in th_cands:
            if strm_bytes(tm, th) <= budget:
                return tm, th, strm_bytes(tm, th)
    # Last resort: smallest tiles, even if our estimate exceeds the budget.
    tm, th = tm_cands[-1], th_cands[-1]
    return tm, th, strm_bytes(tm, th)


# ---------------------------------------------------------------------------
# Parameter preparation (one-time; hoists padding / optional bf16 cast out of the call path)
# ---------------------------------------------------------------------------
def prepare_ffn_params(w1, b1, w2, b2, *, mxu_dtype=None):
    """Pad parameters once to lane-dense (multiple-of-128) feature dims.

    Weights are stored (in_features, out_features) = PyTorch W^T, so y = x @ W + b.
    `mxu_dtype=jnp.bfloat16` casts the matmul operands for native MXU rate (documented
    precision tradeoff).  Biases stay f32 so the bias+ReLU epilogue is f32 on every gen.
    """
    f_in = int(w1.shape[0])
    f_out = int(w2.shape[1])
    f_in_p = _round_up(f_in, 128)
    f_out_p = _round_up(f_out, 128)

    if mxu_dtype is not None:
        w1 = w1.astype(mxu_dtype)
        w2 = w2.astype(mxu_dtype)

    w1_p = jnp.pad(w1, ((0, f_in_p - f_in), (0, f_in_p - f_in)))
    b1_p = jnp.pad(b1.astype(jnp.float32), (0, f_in_p - f_in)).reshape(1, f_in_p)
    w2_p = jnp.pad(w2, ((0, f_in_p - f_in), (0, f_out_p - f_out)))
    b2_p = jnp.pad(b2.astype(jnp.float32), (0, f_out_p - f_out)).reshape(1, f_out_p)
    return (w1_p, b1_p, w2_p, b2_p, f_in, f_out)


# ---------------------------------------------------------------------------
# pallas_call wrapper
# ---------------------------------------------------------------------------
@functools.partial(jax.jit,
                   static_argnames=("tm", "th", "f_out", "single_buf", "vmem_limit"))
def _ffn_pallas(x, w1_p, b1_p, w2_p, b2_p, *, tm, th, f_out, single_buf, vmem_limit):
    out_dtype = x.dtype                      # output keeps the caller's activation dtype
    B, f_in = x.shape
    f_in_p = w1_p.shape[0]
    f_out_p = w2_p.shape[1]

    # Harmonize activation dtype with the MXU operand dtype chosen at prepare time.
    if x.dtype != w1_p.dtype:
        x = x.astype(w1_p.dtype)

    b_p = _round_up(B, tm)
    x_p = jnp.pad(x, ((0, b_p - B), (0, f_in_p - f_in)))

    def _param_spec(shape, index_map):
        # Grid-invariant parameter: single-buffer it when supported (halves weight VMEM).
        if single_buf:
            return pl.BlockSpec(shape, index_map,
                                pipeline_mode=pl.Buffered(buffer_count=1))
        return pl.BlockSpec(shape, index_map)

    flops = 2 * b_p * f_in_p * (f_in_p + f_out_p)
    bytes_accessed = int(
        b_p * f_in_p * x_p.dtype.itemsize
        + b_p * f_out_p * jnp.dtype(out_dtype).itemsize
        + (f_in_p * f_in_p + f_in_p * f_out_p) * w1_p.dtype.itemsize
        + (f_in_p + f_out_p) * 4)
    cost = pl.CostEstimate(flops=flops, transcendentals=0, bytes_accessed=bytes_accessed)

    if th is None:
        # Resident-weight kernel: batch-only grid; params pinned to block (0, 0).
        grid = (b_p // tm,)
        in_specs = [
            pl.BlockSpec((tm, f_in_p), lambda i: (i, 0)),
            _param_spec((f_in_p, f_in_p), lambda i: (0, 0)),
            _param_spec((1, f_in_p), lambda i: (0, 0)),
            _param_spec((f_in_p, f_out_p), lambda i: (0, 0)),
            _param_spec((1, f_out_p), lambda i: (0, 0)),
        ]
        out_spec = pl.BlockSpec((tm, f_out_p), lambda i: (i, 0))
        kernel = _ffn_resident_kernel
        scratch = []
        dims = ("parallel",)
    else:
        # Hidden-dim streaming kernel: (batch tiles, hidden chunks) grid + f32 accumulator.
        grid = (b_p // tm, f_in_p // th)
        in_specs = [
            pl.BlockSpec((tm, f_in_p), lambda i, k: (i, 0)),
            pl.BlockSpec((f_in_p, th), lambda i, k: (0, k)),
            pl.BlockSpec((1, th), lambda i, k: (0, k)),
            pl.BlockSpec((th, f_out_p), lambda i, k: (k, 0)),
            _param_spec((1, f_out_p), lambda i, k: (0, 0)),
        ]
        out_spec = pl.BlockSpec((tm, f_out_p), lambda i, k: (i, 0))
        kernel = _ffn_stream_kernel
        scratch = [pltpu.VMEM((tm, f_out_p), jnp.float32)]
        dims = ("parallel", "arbitrary")

    out_p = pl.pallas_call(
        kernel,
        out_shape=jax.ShapeDtypeStruct((b_p, f_out_p), out_dtype),
        grid_spec=pltpu.PrefetchScalarGridSpec(
            num_scalar_prefetch=0,
            grid=grid,
            in_specs=in_specs,
            out_specs=out_spec,
            scratch_shapes=scratch,
        ),
        compiler_params=pltpu.CompilerParams(
            dimension_semantics=dims,
            vmem_limit_bytes=int(vmem_limit),
        ),
        cost_estimate=cost,
    )(x_p, w1_p, b1_p, w2_p, b2_p)

    # Slice off batch / lane padding.
    return out_p[:B, :f_out]


def feed_forward_network(x, params, *, tm=None, hidden_tile=None):
    """Apply the FFN.  x: (B, F_in); params from prepare_ffn_params()."""
    w1_p, b1_p, w2_p, b2_p, f_in, f_out = params
    assert x.ndim == 2 and x.shape[1] == f_in, (x.shape, f_in)
    B = int(x.shape[0])
    f_in_p = int(w1_p.shape[0])
    f_out_p = int(w2_p.shape[1])
    if hidden_tile is not None:
        assert hidden_tile % 128 == 0 and f_in_p % hidden_tile == 0, (hidden_tile, f_in_p)

    single_buf = _single_buffer_supported()
    budget = _vmem_budget_bytes()

    x_isz = jnp.dtype(w1_p.dtype).itemsize     # activations are cast to the MXU dtype
    o_isz = jnp.dtype(x.dtype).itemsize        # output keeps the input dtype
    p_isz = jnp.dtype(w1_p.dtype).itemsize

    tm_sel, th_sel, est = _plan(B, f_in_p, f_out_p, x_isz, o_isz, p_isz, budget,
                                single_buf, tm_override=tm, th_override=hidden_tile)
    vmem_limit = int(min(max(int(est * 1.25), 32 * 1024 * 1024), budget))

    return _ffn_pallas(x, w1_p, b1_p, w2_p, b2_p,
                       tm=tm_sel, th=th_sel, f_out=f_out,
                       single_buf=single_buf, vmem_limit=vmem_limit)


def _ref_ffn(x, w1, b1, w2, b2):
    # Same math as the PyTorch forward; dropout(p=0) is the identity.
    return jnp.maximum(x @ w1 + b1, 0.0) @ w2 + b2


if __name__ == "__main__":
    # Small shapes consistent with the module: batch=8, in_features=32, out_features=16.
    B, F_in, F_out = 8, 32, 16
    kx, kw1, kb1, kw2, kb2 = jax.random.split(jax.random.PRNGKey(0), 5)
    x = jax.random.normal(kx, (B, F_in), dtype=jnp.float32)
    w1 = jax.random.normal(kw1, (F_in, F_in), dtype=jnp.float32) / jnp.sqrt(F_in)
    b1 = 0.1 * jax.random.normal(kb1, (F_in,), dtype=jnp.float32)
    w2 = jax.random.normal(kw2, (F_in, F_out), dtype=jnp.float32) / jnp.sqrt(F_in)
    b2 = 0.1 * jax.random.normal(kb2, (F_out,), dtype=jnp.float32)
    ref = _ref_ffn(x, w1, b1, w2, b2)

    # 1) f32 resident-weight path: exact semantics of the PyTorch module.
    params = prepare_ffn_params(w1, b1, w2, b2)
    out = feed_forward_network(x, params)
    jax.block_until_ready(out)
    assert out.shape == (B, F_out)
    assert jnp.allclose(out, ref, atol=1e-5, rtol=1e-5)

    # 2) bf16-MXU path (opt-in precision tradeoff) -- looser tolerance by design.
    params_bf16 = prepare_ffn_params(w1, b1, w2, b2, mxu_dtype=jnp.bfloat16)
    out_bf16 = feed_forward_network(x, params_bf16)
    jax.block_until_ready(out_bf16)
    assert jnp.allclose(out_bf16, ref, atol=0.1, rtol=0.05)

    # 3) Hidden-dim streaming path, forced via small tiles to exercise the accumulator
    #    kernel (the same path large-F configs take automatically, e.g. on v7x).
    B2, F_in2, F_out2 = 48, 256, 128
    k2 = jax.random.split(jax.random.PRNGKey(1), 5)
    x2 = jax.random.normal(k2[0], (B2, F_in2), dtype=jnp.float32)
    w1b = jax.random.normal(k2[1], (F_in2, F_in2), dtype=jnp.float32) / jnp.sqrt(F_in2)
    b1b = 0.1 * jax.random.normal(k2[2], (F_in2,), dtype=jnp.float32)
    w2b = jax.random.normal(k2[3], (F_in2, F_out2), dtype=jnp.float32) / jnp.sqrt(F_in2)
    b2b = 0.1 * jax.random.normal(k2[4], (F_out2,), dtype=jnp.float32)
    params2 = prepare_ffn_params(w1b, b1b, w2b, b2b)
    out2 = feed_forward_network(x2, params2, tm=16, hidden_tile=128)
    jax.block_until_ready(out2)
    ref2 = _ref_ffn(x2, w1b, b1b, w2b, b2b)
    assert out2.shape == (B2, F_out2)
    assert jnp.allclose(out2, ref2, atol=1e-3, rtol=1e-3)

    print("KERNEL_OK")
</pallas_src>

<mosaic_0001>
module attributes {stable_mosaic.version = 11 : i64} {
  func.func @_copy(%arg0: i32, %arg1: memref<8x128xf32, #tpu.memory_space<vmem>>, %arg2: memref<8x128xf32, #tpu.memory_space<vmem>>) attributes {dimension_semantics = [#tpu.dimension_semantics<arbitrary>], iteration_bounds = array<i64: 1>, scalar_prefetch = 0 : i64, scratch_operands = 0 : i64, tpu.core_type = #tpu.core_type<tc>, window_params = [{pipeline_mode = #tpu.pipeline_mode<synchronous>, transform_indices = @transform_0, window_bounds = array<i64: 8, 128>}, {pipeline_mode = #tpu.pipeline_mode<synchronous>, transform_indices = @transform_1, window_bounds = array<i64: 8, 128>}]} {
    %c0 = arith.constant 0 : index
    %c0_0 = arith.constant 0 : index
    %0 = vector.load %arg1[%c0, %c0_0] : memref<8x128xf32, #tpu.memory_space<vmem>>, vector<8x128xf32>
    %c0_1 = arith.constant 0 : index
    %c0_2 = arith.constant 0 : index
    %1 = vector.load %arg2[%c0_1, %c0_2] : memref<8x128xf32, #tpu.memory_space<vmem>>, vector<8x128xf32>
    tpu.vector_store %arg2[%c0_1, %c0_2], %0 {strides = array<i32>} : memref<8x128xf32, #tpu.memory_space<vmem>>, vector<8x128xf32>,
    return
  }
  func.func @transform_0(%arg0: i32) -> (i32, i32) {
    %c0_i32 = arith.constant 0 : i32
    %c0_i32_0 = arith.constant 0 : i32
    %c0_i32_1 = arith.constant 0 : i32
    return %c0_i32, %c0_i32_0 : i32, i32
  }
  func.func @transform_1(%arg0: i32) -> (i32, i32) {
    %c0_i32 = arith.constant 0 : i32
    %c0_i32_0 = arith.constant 0 : i32
    %c0_i32_1 = arith.constant 0 : i32
    return %c0_i32, %c0_i32_0 : i32, i32
  }
}

module attributes {stable_mosaic.version = 11 : i64} {
  func.func @_ffn_resident_kernel(%arg0: i32, %arg1: memref<8x128xf32, #tpu.memory_space<vmem>>, %arg2: memref<128x128xf32, #tpu.memory_space<vmem>>, %arg3: memref<1x128xf32, #tpu.memory_space<vmem>>, %arg4: memref<128x128xf32, #tpu.memory_space<vmem>>, %arg5: memref<1x128xf32, #tpu.memory_space<vmem>>, %arg6: memref<8x128xf32, #tpu.memory_space<vmem>>) attributes {dimension_semantics = [#tpu.dimension_semantics<parallel>], iteration_bounds = array<i64: 1>, scalar_prefetch = 0 : i64, scratch_operands = 0 : i64, tpu.core_type = #tpu.core_type<tc>, window_params = [{transform_indices = @transform_0, window_bounds = array<i64: 8, 128>}, {pipeline_mode = #tpu.pipeline_mode<synchronous>, transform_indices = @transform_1, window_bounds = array<i64: 128, 128>}, {pipeline_mode = #tpu.pipeline_mode<synchronous>, transform_indices = @transform_2, window_bounds = array<i64: 1, 128>}, {pipeline_mode = #tpu.pipeline_mode<synchronous>, transform_indices = @transform_3, window_bounds = array<i64: 128, 128>}, {pipeline_mode = #tpu.pipeline_mode<synchronous>, transform_indices = @transform_4, window_bounds = array<i64: 1, 128>}, {transform_indices = @transform_5, window_bounds = array<i64: 8, 128>}]} {
    %c0 = arith.constant 0 : index
    %c0_0 = arith.constant 0 : index
    %0 = vector.load %arg1[%c0, %c0_0] : memref<8x128xf32, #tpu.memory_space<vmem>>, vector<8x128xf32>
    %c0_1 = arith.constant 0 : index
    %c0_2 = arith.constant 0 : index
    %1 = vector.load %arg2[%c0_1, %c0_2] : memref<128x128xf32, #tpu.memory_space<vmem>>, vector<128x128xf32>
    %cst = arith.constant dense<0.000000e+00> : vector<8x128xf32>
    %2 = tpu.matmul %0, %1, %cst {dimension_numbers = #tpu.dot_dimension_numbers<[1], [0], [0], [1], [0, 0, 1, 1], [], []>} : vector<8x128xf32>, vector<128x128xf32>, vector<8x128xf32> -> vector<8x128xf32>
    %c0_3 = arith.constant 0 : index
    %c0_4 = arith.constant 0 : index
    %3 = vector.load %arg3[%c0_3, %c0_4] : memref<1x128xf32, #tpu.memory_space<vmem>>, vector<1x128xf32>
    %4 = vector.broadcast %3 : vector<1x128xf32> to vector<8x128xf32>
    %5 = arith.addf %2, %4 : vector<8x128xf32>
    %cst_5 = arith.constant 0.000000e+00 : f32
    %6 = vector.broadcast %cst_5 : f32 to vector<8x128xf32>
    %7 = arith.maximumf %5, %6 : vector<8x128xf32>
    %c0_6 = arith.constant 0 : index
    %c0_7 = arith.constant 0 : index
    %8 = vector.load %arg4[%c0_6, %c0_7] : memref<128x128xf32, #tpu.memory_space<vmem>>, vector<128x128xf32>
    %cst_8 = arith.constant dense<0.000000e+00> : vector<8x128xf32>
    %9 = tpu.matmul %7, %8, %cst_8 {dimension_numbers = #tpu.dot_dimension_numbers<[1], [0], [0], [1], [0, 0, 1, 1], [], []>} : vector<8x128xf32>, vector<128x128xf32>, vector<8x128xf32> -> vector<8x128xf32>
    %c0_9 = arith.constant 0 : index
    %c0_10 = arith.constant 0 : index
    %10 = vector.load %arg5[%c0_9, %c0_10] : memref<1x128xf32, #tpu.memory_space<vmem>>, vector<1x128xf32>
    %11 = vector.broadcast %10 : vector<1x128xf32> to vector<8x128xf32>
    %12 = arith.addf %9, %11 : vector<8x128xf32>
    %c0_11 = arith.constant 0 : index
    %c0_12 = arith.constant 0 : index
    %13 = vector.load %arg6[%c0_11, %c0_12] : memref<8x128xf32, #tpu.memory_space<vmem>>, vector<8x128xf32>
    tpu.vector_store %arg6[%c0_11, %c0_12], %12 {strides = array<i32>} : memref<8x128xf32, #tpu.memory_space<vmem>>, vector<8x128xf32>,
    return
  }
  func.func @transform_0(%arg0: i32) -> (i32, i32) {
    %c0_i32 = arith.constant 0 : i32
    %c0_i32_0 = arith.constant 0 : i32
    return %arg0, %c0_i32 : i32, i32
  }
  func.func @transform_1(%arg0: i32) -> (i32, i32) {
    %c0_i32 = arith.constant 0 : i32
    %c0_i32_0 = arith.constant 0 : i32
    %c0_i32_1 = arith.constant 0 : i32
    return %c0_i32, %c0_i32_0 : i32, i32
  }
  func.func @transform_2(%arg0: i32) -> (i32, i32) {
    %c0_i32 = arith.constant 0 : i32
    %c0_i32_0 = arith.constant 0 : i32
    %c0_i32_1 = arith.constant 0 : i32
    return %c0_i32, %c0_i32_0 : i32, i32
  }
  func.func @transform_3(%arg0: i32) -> (i32, i32) {
    %c0_i32 = arith.constant 0 : i32
    %c0_i32_0 = arith.constant 0 : i32
    %c0_i32_1 = arith.constant 0 : i32
    return %c0_i32, %c0_i32_0 : i32, i32
  }
  func.func @transform_4(%arg0: i32) -> (i32, i32) {
    %c0_i32 = arith.constant 0 : i32
    %c0_i32_0 = arith.constant 0 : i32
    %c0_i32_1 = arith.constant 0 : i32
    return %c0_i32, %c0_i32_0 : i32, i32
  }
  func.func @transform_5(%arg0: i32) -> (i32, i32) {
    %c0_i32 = arith.constant 0 : i32
    %c0_i32_0 = arith.constant 0 : i32
    return %arg0, %c0_i32 : i32, i32
  }
}

</mosaic_0001>

<bundles_post_ra>
// kernel: tpu_custom_call.1
= control target key start
LH: loop header
LB: loop body
LE: loop exit
PB: predicated region body
PF: predicated region fallthrough
CT: control target
= control target key end

     0   :  { %6 = vsyncpa [#allocation3], 0  ;;  %s124_s0 = inlined_call_operand.hbm [shape: f32[8,128], index: 0, kind: input, shape index: {}]   ;;  %s125_s1 = inlined_call_operand.hbm [shape: f32[8,128], index: 1, kind: output, shape index: {}]  }
   0x1   :  { %7 = vsyncpa [#allocation4], 0  ;;  %s88_s6 = smov [#allocation2]   ;;  %s40_s10 = scalar_lea.hbm %s124_s0, 128 }
   0x2   :  { %s14_s7 = sshll.u32 %s88_s6, 4  ;;  %p41_p0 = scmp.ne.s32.totalorder %s124_s0, %s40_s10  ;;  %s15_s7 = int_to_ptr.vmem [resolvable:$true] %s14_s7 }
   0x3   :  { %p44_p1 = scmp.lt.u32.totalorder %s40_s10, %s124_s0 }
   0x5   :  { %p46_p2 = pnand %p44_p1, %p41_p0 }
   0x7   :  { %49 = shalt.err (!%p46_p2)
}
   0x8   :  { %s50_s15 = scalar_lea.vmem %s15_s7, 128  ;;  %p55_p4 = scmp.lt.s32.totalorder %s15_s7, %s15_s7 }
   0x9   :  { %p51_p3 = scmp.ne.s32.totalorder %s15_s7, %s50_s15  ;;  %p56_p5 = scmp.lt.s32.totalorder %s50_s15, %s50_s15 }
   0xb   :  { %p57_p6 = por %p56_p5, %p55_p4 }
   0xd   :  { %p58_p7 = pnand %p57_p6, %p51_p3 }
   0xf   :  { %61 = shalt.err (!%p58_p7)
}
  0x10   :  { %17 = dma.hbm_to_vmem [thread:$0]  %s124_s0, 128, %s15_s7, [#allocation3]  }
  0x11   :  { %84 = dma.done.wait [#allocation3], 128  }
  0x12   :  { %85 = vsyncadd [#allocation3], 4294967168  ;;  %s89_s18 = smov [#allocation5]   ;;  %v21_v0 = vld [vmem:[#allocation2] sm:$0xff] }
  0x13   :  { %s29_s19 = sshll.u32 %s89_s18, 4  ;;  %22 = vst [vmem:[#allocation5] sm:$0xff] %v21_v0  ;;  %s30_s19 = int_to_ptr.vmem [resolvable:$true] %s29_s19 }
  0x14   :  { %s62_s20 = scalar_lea.vmem %s30_s19, 128  ;;  %p67_p9 = scmp.lt.s32.totalorder %s30_s19, %s30_s19 }
  0x15   :  { %p63_p8 = scmp.ne.s32.totalorder %s30_s19, %s62_s20  ;;  %p68_p10 = scmp.lt.s32.totalorder %s62_s20, %s62_s20 }
  0x17   :  { %p69_p11 = por %p68_p10, %p67_p9 }
  0x19   :  { %p70_p12 = pnand %p69_p11, %p63_p8 }
  0x1b   :  { %73 = shalt.err (!%p70_p12)
}
  0x1c   :  { %s74_s23 = scalar_lea.hbm %s125_s1, 128 }
  0x1d   :  { %p75_p13 = scmp.ne.s32.totalorder %s125_s1, %s74_s23  ;;  %p78_p0 = scmp.lt.u32.totalorder %s74_s23, %s125_s1 }
  0x1f   :  { %p80_p1 = pnand %p78_p0, %p75_p13 }
  0x21   :  { %83 = shalt.err (!%p80_p1)
}
  0x22   :  { %32 = dma.vmem_to_hbm [thread:$0]  %s30_s19, 128, %s125_s1, [#allocation4]  }
  0x23   :  { %86 = dma.done.wait [#allocation4], 128  }
  0x24   :  { %87 = vsyncadd [#allocation4], 4294967168 }
  0x25   :  { %36 = vsyncpa [#allocation3], 1 }
  0x26   :  { %37 = vsyncpa [#allocation4], 1 }

// kernel: _ffn_pallas.1
= control target key start
LH: loop header
LB: loop body
LE: loop exit
PB: predicated region body
PF: predicated region fallthrough
CT: control target
= control target key end

     0   :  { %10 = vsyncpa [#allocation3], 0  ;;  %s587_s0 = inlined_call_operand.vmem [shape: f32[8,128], index: 0, kind: input, shape index: {}]   ;;  %s588_s1 = inlined_call_operand.hbm [shape: f32[128,128], index: 1, kind: input, shape index: {}]   ;;  %s589_s2 = inlined_call_operand.vmem [shape: f32[1,128], index: 2, kind: input, shape index: {}]   ;;  %s590_s3 = inlined_call_operand.hbm [shape: f32[128,128], index: 3, kind: input, shape index: {}]   ;;  %s591_s4 = inlined_call_operand.vmem [shape: f32[1,128], index: 4, kind: input, shape index: {}]   ;;  %s592_s5 = inlined_call_operand.hbm [shape: f32[8,128], index: 5, kind: output, shape index: {}]  }
   0x1   :  { %11 = vsyncpa [#allocation6], 0 }
   0x2   :  { %12 = vsyncpa [#allocation4], 0  ;;  %s488_s18 = smov [#allocation2]   ;;  %s416_s22 = scalar_lea.hbm %s588_s1, 2048 }
   0x3   :  { %s20_s19 = sshll.u32 %s488_s18, 4  ;;  %p417_p0 = scmp.ne.s32.totalorder %s588_s1, %s416_s22  ;;  %s21_s19 = int_to_ptr.vmem [resolvable:$true] %s20_s19 }
   0x4   :  { %p420_p1 = scmp.lt.u32.totalorder %s416_s22, %s588_s1 }
   0x6   :  { %p422_p2 = pnand %p420_p1, %p417_p0 }
   0x8   :  { %425 = shalt.err (!%p422_p2)
}
   0x9   :  { %s426_s27 = scalar_lea.vmem %s21_s19, 2048  ;;  %p431_p4 = scmp.lt.s32.totalorder %s21_s19, %s21_s19 }
   0xa   :  { %p427_p3 = scmp.ne.s32.totalorder %s21_s19, %s426_s27  ;;  %p432_p5 = scmp.lt.s32.totalorder %s426_s27, %s426_s27 }
   0xc   :  { %p433_p6 = por %p432_p5, %p431_p4 }
   0xe   :  { %p434_p7 = pnand %p433_p6, %p427_p3 }
  0x10   :  { %437 = shalt.err (!%p434_p7)
}
  0x11   :  { %s489_s28 = smov 128   ;;  %s490_s29 = smov 8  }
  0x12   :  { %26 = dma.hbm_to_vmem [thread:$0]  %s588_s1, 2048, %s21_s19, [#allocation3], %s489_s28, %s489_s28, %s490_s29  }
  0x13   :  { %s491_s7 = smov [#allocation5]   ;;  %s438_s11 = scalar_lea.hbm %s590_s3, 2048 }
  0x14   :  { %s34_s8 = sshll.u32 %s491_s7, 4  ;;  %p439_p8 = scmp.ne.s32.totalorder %s590_s3, %s438_s11  ;;  %s35_s8 = int_to_ptr.vmem [resolvable:$true] %s34_s8 }
  0x15   :  { %p442_p9 = scmp.lt.u32.totalorder %s438_s11, %s590_s3 }
  0x17   :  { %p444_p10 = pnand %p442_p9, %p439_p8 }
  0x19   :  { %447 = shalt.err (!%p444_p10)
}
  0x1a   :  { %s448_s16 = scalar_lea.vmem %s35_s8, 2048  ;;  %p453_p12 = scmp.lt.s32.totalorder %s35_s8, %s35_s8 }
  0x1b   :  { %p449_p11 = scmp.ne.s32.totalorder %s35_s8, %s448_s16  ;;  %p454_p13 = scmp.lt.s32.totalorder %s448_s16, %s448_s16 }
  0x1d   :  { %p455_p0 = por %p454_p13, %p453_p12 }
  0x1f   :  { %p456_p1 = pnand %p455_p0, %p449_p11 }
  0x21   :  { %459 = shalt.err (!%p456_p1)
}
  0x22   :  { %40 = dma.hbm_to_vmem [thread:$0]  %s590_s3, 2048, %s35_s8, [#allocation6], %s489_s28, %s489_s28, %s490_s29  }
  0x23   :  { %482 = dma.done.wait [#allocation3], 2048  }
  0x24   :  { %483 = vsyncadd [#allocation3], 4294965248 }
  0x25   :  { %484 = dma.done.wait [#allocation6], 2048  }
  0x26   :  { %485 = vsyncadd [#allocation6], 4294965248  ;;  %v492_v0 = vmov 0.0|0.0   ;;  %vm493_vm0 = vmmov 0   ;;  %v494_v1 = vmov 0.0   ;;  %v50_v2 = vld [vmem:[#allocation2] sm:$0xff] }
  0x27   :  { %360 = vmatprep.subr.bf16.mxu0 %v492_v0  ;;  %322 = vmatprep.mubr.msk.f32.mxu0 %vm493_vm0, %v494_v1  ;;  %v51_v3 = vld [vmem:[#allocation2 + $0x8] sm:$0xff]  ;;  %v52_v4 = vld [vmem:[#allocation2 + $0x10] sm:$0xff]  ;;  %v53_v6 = vld [vmem:[#allocation2 + $0x18] sm:$0xff] }
  0x28   :  { %384 = vmatprep.subr.bf16.mxu1 %v492_v0  ;;  %357 = vmatprep.mubr.msk.f32.mxu1 %vm493_vm0, %v494_v1  ;;  %v361_v5 = vpack.c.bf16 %v51_v3, %v50_v2  ;;  %v364_v7 = vpack.c.bf16 %v53_v6, %v52_v4  ;;  %v54_v8 = vld [vmem:[#allocation2 + $0x20] sm:$0xff]  ;;  %v55_v9 = vld [vmem:[#allocation2 + $0x28] sm:$0xff]  ;;  %v146_v12 = vld [vmem:[#allocation5 + $0x10] sm:$0xff] }
  0x29   :  { %v144_v10 = vld [vmem:[#allocation5] sm:$0xff]  ;;  %v145_v11 = vld [vmem:[#allocation5 + $0x8] sm:$0xff]  ;;  %v147_v13 = vld [vmem:[#allocation5 + $0x18] sm:$0xff]  ;;  %v367_v14 = vpack.c.bf16 %v55_v9, %v54_v8 }
  0x2a   :  { %362 = vmatpush3.bf16.msra.mxu0 %v361_v5  ;;  %v385_v15 = vpack.c.bf16 %v145_v11, %v144_v10  ;;  %v56_v16 = vld [vmem:[#allocation2 + $0x30] sm:$0xff]  ;;  %v57_v17 = vld [vmem:[#allocation2 + $0x38] sm:$0xff]  ;;  %v388_v18 = vpack.c.bf16 %v147_v13, %v146_v12  ;;  %v148_v19 = vld [vmem:[#allocation5 + $0x20] sm:$0xff] }
  0x2b   :  { %363 = vmatprep.subr.bf16.mxu0 %v492_v0  ;;  %v149_v20 = vld [vmem:[#allocation5 + $0x28] sm:$0xff]  ;;  %v370_v21 = vpack.c.bf16 %v57_v17, %v56_v16  ;;  %v58_v22 = vld [vmem:[#allocation2 + $0x40] sm:$0xff]  ;;  %v150_v25 = vld [vmem:[#allocation5 + $0x30] sm:$0xff] }
  0x2c   :  { %386 = vmatpush3.bf16.msra.mxu1 %v385_v15  ;;  %v59_v23 = vld [vmem:[#allocation2 + $0x48] sm:$0xff]  ;;  %v391_v24 = vpack.c.bf16 %v149_v20, %v148_v19  ;;  %v151_v26 = vld [vmem:[#allocation5 + $0x38] sm:$0xff]  ;;  %v60_v28 = vld [vmem:[#allocation2 + $0x50] sm:$0xff] }
  0x2d   :  { %387 = vmatprep.subr.bf16.mxu1 %v492_v0  ;;  %v373_v27 = vpack.c.bf16 %v59_v23, %v58_v22  ;;  %v61_v29 = vld [vmem:[#allocation2 + $0x58] sm:$0xff]  ;;  %v394_v30 = vpack.c.bf16 %v151_v26, %v150_v25  ;;  %v152_v31 = vld [vmem:[#allocation5 + $0x40] sm:$0xff]  ;;  %v153_v32 = vld [vmem:[#allocation5 + $0x48] sm:$0xff] }
  0x2e   :  { %365 = vmatpush3.bf16.msra.mxu0 %v364_v7  ;;  %v376_v33 = vpack.c.bf16 %v61_v29, %v60_v28  ;;  %v62_v34 = vld [vmem:[#allocation2 + $0x60] sm:$0xff]  ;;  %v63_v35 = vld [vmem:[#allocation2 + $0x68] sm:$0xff]  ;;  %v397_v36 = vpack.c.bf16 %v153_v32, %v152_v31  ;;  %v154_v37 = vld [vmem:[#allocation5 + $0x50] sm:$0xff] }
  0x2f   :  { %366 = vmatprep.subr.bf16.mxu0 %v492_v0  ;;  %v155_v38 = vld [vmem:[#allocation5 + $0x58] sm:$0xff]  ;;  %v379_v39 = vpack.c.bf16 %v63_v35, %v62_v34  ;;  %v64_v40 = vld [vmem:[#allocation2 + $0x70] sm:$0xff]  ;;  %v156_v43 = vld [vmem:[#allocation5 + $0x60] sm:$0xff] }
  0x30   :  { %389 = vmatpush3.bf16.msra.mxu1 %v388_v18  ;;  %v65_v41 = vld [vmem:[#allocation2 + $0x78] sm:$0xff]  ;;  %v400_v42 = vpack.c.bf16 %v155_v38, %v154_v37  ;;  %v157_v44 = vld [vmem:[#allocation5 + $0x68] sm:$0xff]  ;;  %v158_v48 = vld [vmem:[#allocation5 + $0x70] sm:$0xff] }
  0x31   :  { %390 = vmatprep.subr.bf16.mxu1 %v492_v0  ;;  %v382_v45 = vpack.c.bf16 %v65_v41, %v64_v40  ;;  %v403_v46 = vpack.c.bf16 %v157_v44, %v156_v43  ;;  %v49_v47 = vld [vmem:[%s587_s0] sm:$0xff]  ;;  %s495_s0 = smov [#allocation7]  }
  0x32   :  { %368 = vmatpush3.bf16.msra.mxu0 %v367_v14  ;;  %v159_v49 = vld [vmem:[#allocation5 + $0x78] sm:$0xff]  ;;  %s244_s23 = sshll.u32 %s495_s0, 4  ;;  %s245_s23 = int_to_ptr.vmem [resolvable:$true] %s244_s23 }
  0x33   :  { %369 = vmatprep.subr.bf16.mxu0 %v492_v0  ;;  %v406_v50 = vpack.c.bf16 %v159_v49, %v158_v48  ;;  %v254_v51 = vld [vmem:[%s589_s2] ss:$0 sm:$0xff]  ;;  %s460_s24 = scalar_lea.vmem %s245_s23, 128  ;;  %p465_p3 = scmp.lt.s32.totalorder %s245_s23, %s245_s23 }
  0x34   :  { %392 = vmatpush3.bf16.msra.mxu1 %v391_v24  ;;  %v255_v56 = vld [vmem:[%s591_s4] ss:$0 sm:$0xff]  ;;  %p461_p2 = scmp.ne.s32.totalorder %s245_s23, %s460_s24  ;;  %p466_p4 = scmp.lt.s32.totalorder %s460_s24, %s460_s24 }
  0x35   :  { %393 = vmatprep.subr.bf16.mxu1 %v492_v0 }
  0x36   :  { %371 = vmatpush3.bf16.msra.mxu0 %v370_v21  ;;  %p467_p5 = por %p466_p4, %p465_p3 }
  0x37   :  { %372 = vmatprep.subr.bf16.mxu0 %v492_v0 }
  0x38   :  { %395 = vmatpush3.bf16.msra.mxu1 %v394_v30  ;;  %p468_p6 = pnand %p467_p5, %p461_p2 }
  0x39   :  { %396 = vmatprep.subr.bf16.mxu1 %v492_v0 }
  0x3a   :  { %374 = vmatpush3.bf16.msra.mxu0 %v373_v27 }
  0x3b   :  { %375 = vmatprep.subr.bf16.mxu0 %v492_v0 }
  0x3c   :  { %398 = vmatpush3.bf16.msra.mxu1 %v397_v36 }
  0x3d   :  { %399 = vmatprep.subr.bf16.mxu1 %v492_v0 }
  0x3e   :  { %377 = vmatpush3.bf16.msra.mxu0 %v376_v33 }
  0x3f   :  { %378 = vmatprep.subr.bf16.mxu0 %v492_v0 }
  0x40   :  { %401 = vmatpush3.bf16.msra.mxu1 %v400_v42 }
  0x41   :  { %402 = vmatprep.subr.bf16.mxu1 %v492_v0 }
  0x42   :  { %380 = vmatpush3.bf16.msra.mxu0 %v379_v39 }
  0x43   :  { %381 = vmatprep.subr.bf16.mxu0 %v492_v0 }
  0x44   :  { %404 = vmatpush3.bf16.msra.mxu1 %v403_v46 }
  0x45   :  { %405 = vmatprep.subr.bf16.mxu1 %v492_v0 }
  0x46   :  { %383 = vmatpush3.bf16.msra.mxu0 %v382_v45 }
  0x48   :  { %407 = vmatpush3.bf16.msra.mxu1 %v406_v50 }
  0x49   :  { %323 = vmatmul.mubr.f32.vlgmr.msra.gmra.mrb[0].mxu0 %v49_v47 }
 0x11c   :  { %v139_v52 = vpop.f32.mrb[0].mxu0 }
 0x11d   :  { %v140_v53 = vadd.f32 %v254_v51, %v139_v52  ;;  %v324_v54 = vpop.f32.mrb[1].mxu0 }
 0x11f   :  { %v143_v55 = vmax.f32 %v140_v53, 0.0 }
 0x121   :  { %358 = vmatmul.mubr.f32.vlgmr.msra.gmra.mrb[0].mxu1 %v143_v55 }
 0x1f4   :  { %v233_v57 = vpop.f32.mrb[0].mxu1 }
 0x1f5   :  { %v234_v58 = vadd.f32 %v255_v56, %v233_v57  ;;  %v359_v59 = vpop.f32.mrb[1].mxu1 }
 0x1f7   :  { %237 = vst [vmem:[#allocation7] sm:$0xff] %v234_v58 }
 0x1f8   :  { %471 = shalt.err (!%p468_p6)
}
 0x1f9   :  { %s472_s26 = scalar_lea.hbm %s592_s5, 128 }
 0x1fa   :  { %p473_p7 = scmp.ne.s32.totalorder %s592_s5, %s472_s26  ;;  %p476_p8 = scmp.lt.u32.totalorder %s472_s26, %s592_s5 }
 0x1fc   :  { %p478_p9 = pnand %p476_p8, %p473_p7 }
 0x1fe   :  { %481 = shalt.err (!%p478_p9)
}
 0x1ff   :  { %247 = dma.vmem_to_hbm [thread:$0]  %s245_s23, 128, %s592_s5, [#allocation4]  }
 0x200   :  { %486 = dma.done.wait [#allocation4], 128  }
 0x201   :  { %487 = vsyncadd [#allocation4], 4294967168 }
 0x202   :  { %251 = vsyncpa [#allocation3], 1 }
 0x203   :  { %252 = vsyncpa [#allocation6], 1 }
 0x204   :  { %253 = vsyncpa [#allocation4], 1 }

</bundles_post_ra>
